<compile_context>
chip_gen: v7x
topology: tpu7x:2x2x1
jax: 0.10.0
libtpu: 0.0.40
codegen_flags: <defaults>
</compile_context>

<pallas_src>
import functools

import numpy as np
import jax
import jax.numpy as jnp
from jax.experimental import pallas as pl
from jax.experimental.pallas import tpu as pltpu


def _round_up(x, m):
    return (x + m - 1) // m * m


# ----------------------------------------------------------------------------
# Parameter construction (mirrors the PyTorch get_matrix())
# ----------------------------------------------------------------------------
def _get_stft_matrices(n_fft):
    """Windowed real-DFT analysis matrices, (F, n_fft) each (F = n_fft//2 + 1)."""
    n = np.arange(n_fft, dtype=np.float64)
    # torch.hann_window / hamming_window default periodic=True
    hann = 0.5 - 0.5 * np.cos(2.0 * np.pi * n / n_fft)
    hamming = 0.54 - 0.46 * np.cos(2.0 * np.pi * n / n_fft)
    window = 0.85 * hann + 0.15 * hamming                        # (n_fft,)

    freqs = np.arange(n_fft // 2 + 1, dtype=np.float64)          # (F,)
    ang = -2.0 * np.pi * np.outer(freqs, n) / n_fft              # (F, n_fft)
    matrix_real = np.cos(ang) * window[None, :]                  # (F, n_fft)
    matrix_imag = np.sin(ang) * window[None, :]                  # (F, n_fft)
    return matrix_real.astype(np.float32), matrix_imag.astype(np.float32)


# ----------------------------------------------------------------------------
# Pallas kernel: fused bf16 matmul -> in-kernel transpose -> (F, TILE_L) stores
# ----------------------------------------------------------------------------
def _stft_kernel(frames_ref, w_ref, real_ref, imag_ref, *, f, f_pad):
    # frames: (TILE_L, n_fft) bf16 ; w: (n_fft, 2*F_pad) bf16 (resident)
    res = jnp.dot(frames_ref[...], w_ref[...],
                  preferred_element_type=jnp.float32)            # (TILE_L, 2*F_pad) f32
    # Transpose on the XLU (idle slot here) so the HBM output is (F, TILE_L):
    # lane-dense along frames, no F->128 lane padding, no post-kernel transpose pass.
    real_t = res[:, :f_pad].T                                    # (F_pad, TILE_L)
    imag_t = res[:, f_pad:].T                                    # (F_pad, TILE_L)
    real_ref[...] = real_t[:f, :]
    imag_ref[...] = imag_t[:f, :]


class ConvSTFTPallas:
    TILE_L_MAX = 1024                      # frames per grid step (review: 512-1024)
    VMEM_BUDGET = 20 * 1024 * 1024         # per-step footprint; fits 32 MiB scoped VMEM

    def __init__(self, n_fft, hop_length):
        self.n_fft = n_fft
        self.hop = hop_length
        self.F = n_fft // 2 + 1
        self.F_pad = _round_up(self.F, 128)

        mr, mi = _get_stft_matrices(n_fft)                       # (F, n_fft) f32
        wr = np.zeros((n_fft, self.F_pad), np.float32)
        wi = np.zeros((n_fft, self.F_pad), np.float32)
        wr[:, :self.F] = mr.T
        wi[:, :self.F] = mi.T
        # Fused, lane-padded weight (n_fft, 2*F_pad); bf16 operands, f32 accumulation.
        self.w = jnp.asarray(np.concatenate([wr, wi], axis=1), dtype=jnp.bfloat16)
        # Reference-check copies only.
        self.mr_bf16 = jnp.asarray(mr, dtype=jnp.bfloat16)
        self.mi_bf16 = jnp.asarray(mi, dtype=jnp.bfloat16)
        self.mr_f32 = jnp.asarray(mr)
        self.mi_f32 = jnp.asarray(mi)

    # --- wrapper-side glue: pad + frame the signal (bf16 gather) -------------
    def _frame(self, x):
        B, C, T = x.shape
        assert C == 1
        pad = self.n_fft // 2
        L = (T + 2 * pad - self.n_fft) // self.hop + 1
        # Cast BEFORE the gather so the expanded frames array is written once, in bf16.
        x_pad = jnp.pad(x[:, 0, :].astype(jnp.bfloat16), ((0, 0), (pad, pad)))
        idx = jnp.arange(L)[:, None] * self.hop + jnp.arange(self.n_fft)[None, :]
        frames = x_pad[:, idx]                                   # (B, L, n_fft) bf16
        return frames, L

    # --- tile-size selection (generation-safe, megacore-aware) ---------------
    def _pick_tile(self, B, L):
        n_fft, F, F_pad = self.n_fft, self.F, self.F_pad

        def footprint(t):   # approx double-buffered per-step VMEM bytes
            return (2 * t * n_fft * 2            # frames tile (bf16), 2 buffers
                    + 4 * F * t * 4              # two f32 output tiles, 2 buffers each
                    + 2 * n_fft * 2 * F_pad * 2)  # resident fused weight (2 buffers)

        l_ceil = _round_up(L, 128)
        tile_l = 128
        while (tile_l * 2 <= min(self.TILE_L_MAX, l_ceil)
               and footprint(tile_l * 2) <= self.VMEM_BUDGET):
            tile_l *= 2
        # v7x megacore: keep >= 2 parallel grid steps when the data allows it.
        if B * (-(-L // tile_l)) < 2 and tile_l > 128:
            tile_l //= 2
        return tile_l

    def __call__(self, x):
        B = x.shape[0]
        n_fft, F, F_pad = self.n_fft, self.F, self.F_pad

        frames, L = self._frame(x)                               # (B, L, n_fft) bf16
        tile_l = self._pick_tile(B, L)
        L_pad = _round_up(L, tile_l)
        if L_pad != L:
            frames = jnp.pad(frames, ((0, 0), (0, L_pad - L), (0, 0)))
        n_tiles = L_pad // tile_l

        flops = 2 * B * L_pad * n_fft * (2 * F_pad)
        bytes_accessed = (B * L_pad * n_fft * 2                  # frames (bf16)
                          + n_fft * 2 * F_pad * 2                # fused weight (bf16)
                          + 2 * B * F * L_pad * 4)               # two f32 outputs

        real, imag = pl.pallas_call(
            functools.partial(_stft_kernel, f=F, f_pad=F_pad),
            out_shape=(jax.ShapeDtypeStruct((B, F, L_pad), jnp.float32),
                       jax.ShapeDtypeStruct((B, F, L_pad), jnp.float32)),
            grid=(B, n_tiles),
            in_specs=[
                pl.BlockSpec((None, tile_l, n_fft), lambda b, i: (b, i, 0)),   # streamed
                pl.BlockSpec((n_fft, 2 * F_pad), lambda b, i: (0, 0)),         # resident
            ],
            out_specs=(
                pl.BlockSpec((None, F, tile_l), lambda b, i: (b, 0, i)),
                pl.BlockSpec((None, F, tile_l), lambda b, i: (b, 0, i)),
            ),
            compiler_params=pltpu.CompilerParams(
                dimension_semantics=("parallel", "parallel"),
                vmem_limit_bytes=32 * 1024 * 1024,
            ),
            cost_estimate=pl.CostEstimate(
                flops=flops, transcendentals=0, bytes_accessed=bytes_accessed),
        )(frames, self.w)

        # Kernel already produced (B, F, L_pad) — only drop the frame padding.
        return real[:, :, :L], imag[:, :, :L]


# ----------------------------------------------------------------------------
# References: bf16-matched (same math as kernel) and an f32 oracle
# ----------------------------------------------------------------------------
def _reference_bf16(module, x):
    frames, L = module._frame(x)                                 # (B, L, n_fft) bf16
    real = jnp.einsum("blk,fk->bfl", frames, module.mr_bf16,
                      preferred_element_type=jnp.float32)
    imag = jnp.einsum("blk,fk->bfl", frames, module.mi_bf16,
                      preferred_element_type=jnp.float32)
    return real, imag


def _reference_f32(module, x):
    B, _, T = x.shape
    pad = module.n_fft // 2
    L = (T + 2 * pad - module.n_fft) // module.hop + 1
    x_pad = jnp.pad(x[:, 0, :], ((0, 0), (pad, pad)))
    idx = jnp.arange(L)[:, None] * module.hop + jnp.arange(module.n_fft)[None, :]
    frames = x_pad[:, idx]                                       # (B, L, n_fft) f32
    real = jnp.einsum("blk,fk->bfl", frames, module.mr_f32)
    imag = jnp.einsum("blk,fk->bfl", frames, module.mi_f32)
    return real, imag


if __name__ == "__main__":
    # Small deterministic example consistent with the module's forward: (B, 1, T)
    n_fft = 128
    hop_length = 32
    B, T = 2, 256

    key = jax.random.PRNGKey(0)
    x = jax.random.normal(key, (B, 1, T), dtype=jnp.float32)

    module = ConvSTFTPallas(n_fft=n_fft, hop_length=hop_length)

    real, imag = module(x)
    real = jax.block_until_ready(real)
    imag = jax.block_until_ready(imag)

    F = n_fft // 2 + 1
    L = (T + 2 * (n_fft // 2) - n_fft) // hop_length + 1         # == T//hop + 1 here
    assert real.shape == (B, F, L), real.shape
    assert imag.shape == (B, F, L), imag.shape

    # Tight check vs a pure-JAX reference using the same bf16-operand / f32-acc math.
    ref_real, ref_imag = _reference_bf16(module, x)
    ref_real = jax.block_until_ready(ref_real)
    ref_imag = jax.block_until_ready(ref_imag)
    assert jnp.allclose(real, ref_real, rtol=1e-2, atol=1e-2), "real mismatch (bf16 ref)"
    assert jnp.allclose(imag, ref_imag, rtol=1e-2, atol=1e-2), "imag mismatch (bf16 ref)"

    # Loose check vs the f32 oracle (bf16 operands -> small absolute error expected).
    orc_real, orc_imag = _reference_f32(module, x)
    err = max(float(jnp.max(jnp.abs(real - orc_real))),
              float(jnp.max(jnp.abs(imag - orc_imag))))
    assert err < 0.5, f"f32-oracle error too large: {err}"

    print("KERNEL_OK")
</pallas_src>

<mosaic_0001>
module attributes {stable_mosaic.version = 11 : i64} {
  func.func @_stft_kernel(%arg0: i32, %arg1: i32, %arg2: memref<1x128x128xbf16, #tpu.memory_space<vmem>>, %arg3: memref<128x256xbf16, #tpu.memory_space<vmem>>, %arg4: memref<1x65x128xf32, #tpu.memory_space<vmem>>, %arg5: memref<1x65x128xf32, #tpu.memory_space<vmem>>) attributes {dimension_semantics = [#tpu.dimension_semantics<parallel>, #tpu.dimension_semantics<parallel>], iteration_bounds = array<i64: 2, 1>, scalar_prefetch = 0 : i64, scratch_operands = 0 : i64, tpu.core_type = #tpu.core_type<tc>, window_params = [{transform_indices = @transform_0, window_bounds = array<i64: 1, 128, 128>}, {pipeline_mode = #tpu.pipeline_mode<synchronous>, transform_indices = @transform_1, window_bounds = array<i64: 128, 256>}, {transform_indices = @transform_2, window_bounds = array<i64: 1, 65, 128>}, {transform_indices = @transform_3, window_bounds = array<i64: 1, 65, 128>}]} {
    %c0 = arith.constant 0 : index
    %c0_0 = arith.constant 0 : index
    %c0_1 = arith.constant 0 : index
    %0 = vector.load %arg2[%c0, %c0_0, %c0_1] : memref<1x128x128xbf16, #tpu.memory_space<vmem>>, vector<1x128x128xbf16>
    %1 = vector.shape_cast %0 : vector<1x128x128xbf16> to vector<128x128xbf16>
    %c0_2 = arith.constant 0 : index
    %c0_3 = arith.constant 0 : index
    %2 = vector.load %arg3[%c0_2, %c0_3] : memref<128x256xbf16, #tpu.memory_space<vmem>>, vector<128x256xbf16>
    %cst = arith.constant dense<0.000000e+00> : vector<128x256xf32>
    %3 = tpu.matmul %1, %2, %cst {dimension_numbers = #tpu.dot_dimension_numbers<[1], [0], [0], [1], [0, 0, 1, 1], [], []>} : vector<128x128xbf16>, vector<128x256xbf16>, vector<128x256xf32> -> vector<128x256xf32>
    %4 = vector.extract_strided_slice %3 {offsets = [0, 0], sizes = [128, 128], strides = [1, 1]} : vector<128x256xf32> to vector<128x128xf32>
    %5 = tpu.transpose %4, [1, 0] : vector<128x128xf32> -> vector<128x128xf32>
    %6 = vector.extract_strided_slice %3 {offsets = [0, 128], sizes = [128, 128], strides = [1, 1]} : vector<128x256xf32> to vector<128x128xf32>
    %7 = tpu.transpose %6, [1, 0] : vector<128x128xf32> -> vector<128x128xf32>
    %8 = vector.extract_strided_slice %5 {offsets = [0, 0], sizes = [65, 128], strides = [1, 1]} : vector<128x128xf32> to vector<65x128xf32>
    %c0_4 = arith.constant 0 : index
    %c0_5 = arith.constant 0 : index
    %c0_6 = arith.constant 0 : index
    %9 = vector.load %arg4[%c0_4, %c0_5, %c0_6] : memref<1x65x128xf32, #tpu.memory_space<vmem>>, vector<1x65x128xf32>
    %10 = vector.shape_cast %9 : vector<1x65x128xf32> to vector<65x128xf32>
    %11 = vector.shape_cast %8 : vector<65x128xf32> to vector<1x65x128xf32>
    tpu.vector_store %arg4[%c0_4, %c0_5, %c0_6], %11 {strides = array<i32>} : memref<1x65x128xf32, #tpu.memory_space<vmem>>, vector<1x65x128xf32>,
    %12 = vector.extract_strided_slice %7 {offsets = [0, 0], sizes = [65, 128], strides = [1, 1]} : vector<128x128xf32> to vector<65x128xf32>
    %c0_7 = arith.constant 0 : index
    %c0_8 = arith.constant 0 : index
    %c0_9 = arith.constant 0 : index
    %13 = vector.load %arg5[%c0_7, %c0_8, %c0_9] : memref<1x65x128xf32, #tpu.memory_space<vmem>>, vector<1x65x128xf32>
    %14 = vector.shape_cast %13 : vector<1x65x128xf32> to vector<65x128xf32>
    %15 = vector.shape_cast %12 : vector<65x128xf32> to vector<1x65x128xf32>
    tpu.vector_store %arg5[%c0_7, %c0_8, %c0_9], %15 {strides = array<i32>} : memref<1x65x128xf32, #tpu.memory_space<vmem>>, vector<1x65x128xf32>,
    return
  }
  func.func @transform_0(%arg0: i32, %arg1: i32) -> (i32, i32, i32) {
    %c0_i32 = arith.constant 0 : i32
    %c0_i32_0 = arith.constant 0 : i32
    return %arg0, %arg1, %c0_i32 : i32, i32, i32
  }
  func.func @transform_1(%arg0: i32, %arg1: i32) -> (i32, i32) {
    %c0_i32 = arith.constant 0 : i32
    %c0_i32_0 = arith.constant 0 : i32
    %c0_i32_1 = arith.constant 0 : i32
    return %c0_i32, %c0_i32_0 : i32, i32
  }
  func.func @transform_2(%arg0: i32, %arg1: i32) -> (i32, i32, i32) {
    %c0_i32 = arith.constant 0 : i32
    %c0_i32_0 = arith.constant 0 : i32
    return %arg0, %c0_i32, %arg1 : i32, i32, i32
  }
  func.func @transform_3(%arg0: i32, %arg1: i32) -> (i32, i32, i32) {
    %c0_i32 = arith.constant 0 : i32
    %c0_i32_0 = arith.constant 0 : i32
    return %arg0, %c0_i32, %arg1 : i32, i32, i32
  }
}

</mosaic_0001>

<bundles_post_ra>
// kernel: tpu_custom_call.1
= control target key start
LH: loop header
LB: loop body
LE: loop exit
PB: predicated region body
PF: predicated region fallthrough
CT: control target
= control target key end

     0   :  { %9 = vsyncpa [#allocation3], 0  ;;  %s1259_s0 = inlined_call_operand.hbm [shape: bf16[2,128,128], index: 0, kind: input, shape index: {}]   ;;  %s1260_s1 = inlined_call_operand.hbm [shape: bf16[128,256], index: 1, kind: input, shape index: {}]   ;;  %s1261_s2 = inlined_call_operand.vmem [shape: f32[2,65,128], index: 2, kind: output, shape index: {0}]   ;;  %s1262_s3 = inlined_call_operand.vmem [shape: f32[2,65,128], index: 3, kind: output, shape index: {1}]  }
   0x1   :  { %11 = vsyncpa [#allocation3 + $0x1], 0 }
   0x2   :  { %12 = vsyncpa [#allocation5], 0  ;;  %s1058_s12 = smov 0   ;;  %s1060_s13 = smov 0  }
   0x3   :  { %s1062_s14 = smov 0   ;;  %s1064_s15 = smov 0  }
   0x4   :  { %s1066_s16 = smov 0   ;;  %s1068_s17 = smov 0  }
   0x5 LB: > { %s757_s18 = sadd.s32 4294967295, %s1029_s17   ;;  %p52_p0 = scmp.ne.s32.totalorder %s1013_s13, %s1009_s12  ;;  %s1029_s17 = sphi %s1068_s17, %s18_s17   ;;  %s1025_s16 = sphi %s1066_s16, %s1279_s16   ;;  %s1021_s15 = sphi %s1064_s15, %s1278_s15   ;;  %s1017_s14 = sphi %s1062_s14, %s1277_s14   ;;  %s1013_s13 = sphi %s1060_s13, %s1276_s13   ;;  %s1009_s12 = sphi %s1058_s12, %s1275_s12  }
   0x6   : > { %p1088_p1 = scmp.eq.s32.totalorder %s757_s18, 0  ;;  %p759_p2 = scmp.ge.s32.totalorder %s1029_s17, 1 }
   0x7   : > { %p140_p3 = scmp.lt.s32.totalorder %s1029_s17, 3  ;;  %s1031_s22 = smov [#allocation4]  }
   0x8   : > { %s1267_s19 = scalar_select %p1088_p1, 1, 0 }
   0x9   : > { %p1096_p4 = por %p1088_p1, %p52_p0  ;;  %p1100_p5 = pnand %p759_p2, %p140_p3 }
   0xa   : > { %s152_s23 = sshll.u32 %s1031_s22, 4  ;;  %s30_s25 = sadd.s32 1, %s1025_s16  ;;  %s153_s23 = int_to_ptr.vmem [resolvable:$true] %s152_s23 }
   0xb   : > { %s1268_s20 = scalar_select %p1096_p4, 1, 0 }
   0xc   : > { %s1269_s21 = scalar_select %p1100_p5, 1, 0 }
   0xd   : > { %p820_p6 = pneg %p1100_p5  ;;  %s917_s28 = scalar_lea.hbm %s1260_s1, 2048 }
   0xe   : > { %p918_p8 = scmp.ne.s32.totalorder %s1260_s1, %s917_s28  ;;  %p924_p12 = scmp.lt.u32.totalorder %s917_s28, %s1260_s1 }
   0xf   : > { %p1108_p7 = pnand %p820_p6, %p1088_p1 }
  0x11   : > { %p919_p9 = pneg %p1108_p7 }
  0x13   : > { %p920_p10 = pnand %p919_p9, %p918_p8 }
  0x15   : > { %p921_p11 = pneg %p920_p10 }
  0x17   : > { %p926_p13 = pnand %p924_p12, %p921_p11 }
  0x19   : > { %929 = shalt.err (!%p926_p13)
}
  0x1a   : > { %s930_s6 = scalar_lea.vmem %s153_s23, 2048  ;;  %p938_p6 = scmp.lt.s32.totalorder %s153_s23, %s153_s23 }
  0x1b   : > { %p931_p0 = scmp.ne.s32.totalorder %s153_s23, %s930_s6  ;;  %p939_p1 = scmp.lt.s32.totalorder %s930_s6, %s930_s6 }
  0x1d   : > { %p933_p2 = pnand %p931_p0, %p919_p9  ;;  %p940_p4 = por %p939_p1, %p938_p6 }
  0x1f   : > { %p934_p3 = pneg %p933_p2 }
  0x21   : > { %p941_p5 = pnand %p940_p4, %p934_p3 }
  0x23   : > { %944 = shalt.err (!%p941_p5)
}
  0x24   : > { %s1032_s7 = smov 128   ;;  %s1033_s8 = smov 8  }
  0x25   : > { %823 = dma.hbm_to_vmem [thread:$0]  (!%p1108_p7), %s1260_s1, 2048, %s153_s23, [#allocation5], %s1032_s7, %s1032_s7, %s1033_s8  }
  0x26   : > { %p32_p1 = scmp.ge.s32.totalorder %s30_s25, 2  ;;  %s39_s11 = sadd.s32 1, %s1017_s14 }
  0x27   : > { %p46_p4 = scmp.ne.s32.totalorder %s1017_s14, %s1013_s13  ;;  %p47_p5 = scmp.eq.s32.totalorder %s1029_s17, 0 }
  0x28   : > { %s1281_s25 = smov (%p32_p1, %s30_s25), 0  ;;  %p829_p9 = scmp.lt.s32.totalorder %s1029_s17, 2 }
  0x29   : > { %p48_p8 = por %p47_p5, %p46_p4  ;;  %s34_s12 = ssub.s32 %s1025_s16, %s1281_s25 }
  0x2a   : > { %s166_s18 = sand.u32 1, %s1017_s14   ;;  %p37_p10 = scmp.eq.s32.totalorder %s34_s12, 0 }
  0x2b   : > { %s762_s22 = sshll.u32 %s166_s18, 6  ;;  %s796_s26 = sshll.u32 %s1025_s16, 10 }
  0x2c   : > { %s1141_s27 = scalar_select %p37_p10, %s1017_s14, %s39_s11  }
  0x2d   : > { %s1146_s23 = scalar_lea.hbm %s1259_s0, %s796_s26  ;;  %s170_s29 = scalar_lea.vmem [#allocation2], %s762_s22 }
  0x2e   : > { %s179_s30 = sshll.u32 %s170_s29, 4  ;;  %p1148_p7 = pnand %p829_p9, %p48_p8  ;;  %s1152_s30 = int_to_ptr.vmem [resolvable:$true] %s179_s30 }
  0x2f   : > { %s1154_s5 = scalar_lea.sflag [#allocation3], %s166_s18  ;;  %s945_s6 = scalar_lea.hbm %s1146_s23, 1024 }
  0x30   : > { %p946_p11 = scmp.ne.s32.totalorder %s1146_s23, %s945_s6  ;;  %p947_p12 = pneg %p1148_p7 }
  0x31   : > { %s950_s9 = scalar_lea.hbm %s1259_s0, 2048  ;;  %p951_p2 = scmp.lt.u32.totalorder %s1146_s23, %s1259_s0 }
  0x32   : > { %p948_p13 = pnand %p947_p12, %p946_p11  ;;  %p952_p3 = scmp.lt.u32.totalorder %s950_s9, %s945_s6 }
  0x33   : > { %p954_p1 = scmp.lt.u32.totalorder %s945_s6, %s1146_s23 }
  0x34   : > { %p949_p0 = pneg %p948_p13  ;;  %p953_p6 = por %p952_p3, %p951_p2 }
  0x36   : > { %p955_p4 = por %p954_p1, %p953_p6 }
  0x38   : > { %p956_p5 = pnand %p955_p4, %p949_p0 }
  0x3a   : > { %959 = shalt.err (!%p956_p5)
}
  0x3b   : > { %s960_s12 = scalar_lea.vmem %s1152_s30, 1024  ;;  %s1034_s18 = smov [#allocation2]  }
  0x3c   : > { %p961_p8 = scmp.ne.s32.totalorder %s1152_s30, %s960_s12  ;;  %s965_s22 = sshll.u32 %s1034_s18, 4  ;;  %s966_s22 = int_to_ptr.vmem [resolvable:$false] %s965_s22 }
  0x3d   : > { %s967_s26 = scalar_lea.vmem %s966_s22, 2048  ;;  %p968_p11 = scmp.lt.s32.totalorder %s1152_s30, %s966_s22 }
  0x3e   : > { %p963_p9 = pnand %p961_p8, %p947_p12  ;;  %p969_p13 = scmp.lt.s32.totalorder %s967_s26, %s960_s12 }
  0x40   : > { %p964_p10 = pneg %p963_p9  ;;  %p970_p2 = por %p969_p13, %p968_p11 }
  0x42   : > { %p971_p3 = pnand %p970_p2, %p964_p10 }
  0x44   : > { %974 = shalt.err (!%p971_p3)
}
  0x45   : > { %s1035_s24 = smov 64   ;;  %s1036_s28 = smov 4  }
  0x46   : > { %827 = dma.hbm_to_vmem [thread:$0]  (!%p1148_p7), %s1146_s23, 1024, %s1152_s30, %s1154_s5, %s1035_s24, %s1035_s24, %s1036_s28  }
  0x47   : > { %p1272_p12 = scmp.ne.s32.totalorder %s1269_s21, 0 }
  0x48   : > { %s193_s29 = sand.u32 (!%p1272_p12), 1, %s1013_s13   ;;  %p1273_p0 = scmp.ne.s32.totalorder (!%p1272_p12), %s1268_s20, 0 }
  0x49   : > { %191 = sbr.rel (%p1272_p12) target bundleno = 493 (0x1ed), region = 28  ;;  %s766_s6 = sshll.u32 (!%p1272_p12), %s193_s29, 6 }
  0x4a   : > { %s194_s7 = scalar_lea.sflag (!%p1272_p12), [#allocation3], %s193_s29  ;;  %s1185_s8 = scalar_lea.vmem (!%p1272_p12), [#allocation2], %s766_s6 }
  0x50   : > { %1000 = dma.done.wait (%p1273_p0), %s194_s7, 1024  }
  0x51   : > { %1002 = vsyncadd (%p1273_p0), %s194_s7, 4294966272  ;;  %p1274_p6 = scmp.ne.s32.totalorder %s1267_s19, 0 }
  0x53   : > { %1004 = dma.done.wait (%p1274_p6), [#allocation5], 2048  }
  0x54   : > { %1006 = vsyncadd (%p1274_p6), [#allocation5], 4294965248  ;;  %v1037_v0 = vmov 0   ;;  %v885_v1 = vld [vmem:[#allocation4 + $0x4] ss:$8 sps:$4 sm:$0xff]   ;;  %v911_v21 = vld [vmem:[%s1185_s8 + $0x10] sm:$0xff]  }
  0x55   : > { %445 = vmatprep.mubr.bf16.mxu0 %v1037_v0  ;;  %485 = vmatprep.mubr.bf16.mxu1 %v1037_v0  ;;  %v887_v2 = vld [vmem:[#allocation4] ss:$8 sps:$4 sm:$0xff]   ;;  %v888_v3 = vld [vmem:[#allocation4 + $0x14] ss:$8 sps:$4 sm:$0xff]   ;;  %v890_v4 = vld [vmem:[#allocation4 + $0x10] ss:$8 sps:$4 sm:$0xff]  }
  0x56   : > { %413 = vmatprep.subr.bf16.mxu0 %v885_v1  ;;  %797 = vmatprep.subr.bf16.mxu1 %v885_v1  ;;  %v891_v5 = vld [vmem:[#allocation4 + $0x24] ss:$8 sps:$4 sm:$0xff]   ;;  %v893_v6 = vld [vmem:[#allocation4 + $0x20] ss:$8 sps:$4 sm:$0xff]   ;;  %v894_v7 = vld [vmem:[#allocation4 + $0x34] ss:$8 sps:$4 sm:$0xff]  }
  0x57   : > { %414 = vmatpush1.bf16.msra.mxu0 %v887_v2  ;;  %805 = vmatpush1.bf16.msra.mxu1 %v887_v2  ;;  %v896_v8 = vld [vmem:[#allocation4 + $0x30] ss:$8 sps:$4 sm:$0xff]   ;;  %v897_v9 = vld [vmem:[#allocation4 + $0x44] ss:$8 sps:$4 sm:$0xff]   ;;  %v899_v10 = vld [vmem:[#allocation4 + $0x40] ss:$8 sps:$4 sm:$0xff]  }
  0x58   : > { %415 = vmatprep.subr.bf16.mxu0 %v888_v3  ;;  %798 = vmatprep.subr.bf16.mxu1 %v888_v3  ;;  %v900_v11 = vld [vmem:[#allocation4 + $0x54] ss:$8 sps:$4 sm:$0xff]   ;;  %v902_v12 = vld [vmem:[#allocation4 + $0x50] ss:$8 sps:$4 sm:$0xff]   ;;  %v903_v13 = vld [vmem:[#allocation4 + $0x64] ss:$8 sps:$4 sm:$0xff]  }
  0x59   : > { %v905_v14 = vld [vmem:[#allocation4 + $0x60] ss:$8 sps:$4 sm:$0xff]   ;;  %v906_v15 = vld [vmem:[#allocation4 + $0x74] ss:$8 sps:$4 sm:$0xff]   ;;  %v908_v16 = vld [vmem:[#allocation4 + $0x70] ss:$8 sps:$4 sm:$0xff]  }
  0x5a   : > { %v909_v17 = vld [vmem:[%s1185_s8] sm:$0xff]   ;;  %v910_v19 = vld [vmem:[%s1185_s8 + $0x8] sm:$0xff]   ;;  %v915_v22 = vld [vmem:[%s1185_s8 + $0x30] sm:$0xff]   ;;  %p236_p7 = scmp.lt.s32.totalorder %s1021_s15, 1 }
  0x5b   : > { %416 = vmatpush1.bf16.msra.mxu0 %v890_v4  ;;  %806 = vmatpush1.bf16.msra.mxu1 %v890_v4  ;;  %v913_v18 = vld [vmem:[%s1185_s8 + $0x20] sm:$0xff]   ;;  %v914_v20 = vld [vmem:[%s1185_s8 + $0x28] sm:$0xff]   ;;  %v912_v23 = vld [vmem:[%s1185_s8 + $0x18] sm:$0xff]  }
  0x5c   : > { %417 = vmatprep.subr.bf16.mxu0 %v891_v5  ;;  %799 = vmatprep.subr.bf16.mxu1 %v891_v5  ;;  %v916_v24 = vld [vmem:[%s1185_s8 + $0x38] sm:$0xff]   ;;  %s1283_s15 = smov (!%p236_p7, %s1021_s15), 1 }
  0x5d   : > { %s813_s19 = smul.u32 72, %s1283_s15 }
  0x5f   : > { %418 = vmatpush1.bf16.msra.mxu0 %v893_v6  ;;  %807 = vmatpush1.bf16.msra.mxu1 %v893_v6  ;;  %s1216_s23 = scalar_lea.vmem %s1261_s2, %s813_s19  ;;  %s1221_s5 = scalar_lea.vmem %s1262_s3, %s813_s19 }
  0x60   : > { %419 = vmatprep.subr.bf16.mxu0 %v894_v7  ;;  %800 = vmatprep.subr.bf16.mxu1 %v894_v7 }
  0x63   : > { %420 = vmatpush1.bf16.msra.mxu0 %v896_v8  ;;  %808 = vmatpush1.bf16.msra.mxu1 %v896_v8 }
  0x64   : > { %421 = vmatprep.subr.bf16.mxu0 %v897_v9  ;;  %801 = vmatprep.subr.bf16.mxu1 %v897_v9 }
  0x67   : > { %422 = vmatpush1.bf16.msra.mxu0 %v899_v10  ;;  %809 = vmatpush1.bf16.msra.mxu1 %v899_v10 }
  0x68   : > { %423 = vmatprep.subr.bf16.mxu0 %v900_v11  ;;  %802 = vmatprep.subr.bf16.mxu1 %v900_v11 }
  0x6b   : > { %424 = vmatpush1.bf16.msra.mxu0 %v902_v12  ;;  %810 = vmatpush1.bf16.msra.mxu1 %v902_v12 }
  0x6c   : > { %425 = vmatprep.subr.bf16.mxu0 %v903_v13  ;;  %803 = vmatprep.subr.bf16.mxu1 %v903_v13 }
  0x6f   : > { %426 = vmatpush1.bf16.msra.mxu0 %v905_v14  ;;  %811 = vmatpush1.bf16.msra.mxu1 %v905_v14 }
  0x70   : > { %427 = vmatprep.subr.bf16.mxu0 %v906_v15  ;;  %804 = vmatprep.subr.bf16.mxu1 %v906_v15 }
  0x73   : > { %428 = vmatpush1.bf16.msra.mxu0 %v908_v16  ;;  %812 = vmatpush1.bf16.msra.mxu1 %v908_v16 }
  0x76   : > { %446 = vmatmul.mubr.bf16.vlgmr.msra.gmra.mrb[0].mxu0 %v909_v17  ;;  %486 = vmatmul.mubr.bf16.vlgmr.msra.gmra.mrb[0].mxu1 %v913_v18 }
  0x77   : > { %455 = vmatprep.mubr.bf16.mxu0 %v1037_v0  ;;  %495 = vmatprep.mubr.bf16.mxu1 %v1037_v0 }
  0x7e   : > { %456 = vmatmul.mubr.bf16.gmra.mrb[4].mxu0 %v910_v19  ;;  %496 = vmatmul.mubr.bf16.gmra.mrb[4].mxu1 %v914_v20 }
  0x7f   : > { %465 = vmatprep.mubr.bf16.mxu0 %v1037_v0  ;;  %505 = vmatprep.mubr.bf16.mxu1 %v1037_v0 }
  0x86   : > { %466 = vmatmul.mubr.bf16.gmra.mrb[8].mxu0 %v911_v21  ;;  %506 = vmatmul.mubr.bf16.gmra.mrb[8].mxu1 %v915_v22 }
  0x87   : > { %475 = vmatprep.mubr.bf16.mxu0 %v1037_v0  ;;  %515 = vmatprep.mubr.bf16.mxu1 %v1037_v0 }
  0x8e   : > { %476 = vmatmul.mubr.bf16.gmra.mrb[12].mxu0 %v912_v23  ;;  %516 = vmatmul.mubr.bf16.gmra.mrb[12].mxu1 %v916_v24 }
 0x149   : > { %v447_v25 = vpop.f32.mrb[0].mxu0  ;;  %v487_v26 = vpop.f32.mrb[0].mxu1 }
 0x14a   : > { %526 = vxpose.xlu0.b32.start [1/16] (narrow) %v447_v25, 72  ;;  %v449_v27 = vpop.f32.mrb[1].mxu0  ;;  %v489_v28 = vpop.f32.mrb[1].mxu1 }
 0x14b   : > { %558 = vxpose.xlu1.b32.start [1/16] (narrow) %v449_v27, 72  ;;  %v451_v29 = vpop.f32.mrb[2].mxu0  ;;  %v491_v30 = vpop.f32.mrb[2].mxu1 }
 0x14c   : > { %v453_v31 = vpop.f32.mrb[3].mxu0  ;;  %v493_v32 = vpop.f32.mrb[3].mxu1 }
 0x14e   : > { %527 = vxpose.xlu0.b32.cont [2/16] (narrow) %v451_v29, 72 }
 0x14f   : > { %559 = vxpose.xlu1.b32.cont [2/16] (narrow) %v453_v31, 72 }
 0x151   : > { %v457_v33 = vpop.f32.mrb[4].mxu0  ;;  %v497_v34 = vpop.f32.mrb[4].mxu1 }
 0x152   : > { %528 = vxpose.xlu0.b32.cont [3/16] (narrow) %v457_v33, 72  ;;  %v459_v35 = vpop.f32.mrb[5].mxu0  ;;  %v499_v36 = vpop.f32.mrb[5].mxu1 }
 0x153   : > { %560 = vxpose.xlu1.b32.cont [3/16] (narrow) %v459_v35, 72  ;;  %v461_v37 = vpop.f32.mrb[6].mxu0  ;;  %v501_v38 = vpop.f32.mrb[6].mxu1 }
 0x154   : > { %v463_v39 = vpop.f32.mrb[7].mxu0  ;;  %v503_v40 = vpop.f32.mrb[7].mxu1 }
 0x156   : > { %529 = vxpose.xlu0.b32.cont [4/16] (narrow) %v461_v37, 72 }
 0x157   : > { %561 = vxpose.xlu1.b32.cont [4/16] (narrow) %v463_v39, 72 }
 0x159   : > { %v467_v41 = vpop.f32.mrb[8].mxu0  ;;  %v507_v42 = vpop.f32.mrb[8].mxu1 }
 0x15a   : > { %530 = vxpose.xlu0.b32.cont [5/16] (narrow) %v467_v41, 72  ;;  %v469_v43 = vpop.f32.mrb[9].mxu0  ;;  %v509_v44 = vpop.f32.mrb[9].mxu1 }
 0x15b   : > { %562 = vxpose.xlu1.b32.cont [5/16] (narrow) %v469_v43, 72  ;;  %v471_v45 = vpop.f32.mrb[10].mxu0  ;;  %v511_v46 = vpop.f32.mrb[10].mxu1 }
 0x15c   : > { %v473_v47 = vpop.f32.mrb[11].mxu0  ;;  %v513_v48 = vpop.f32.mrb[11].mxu1 }
 0x15e   : > { %531 = vxpose.xlu0.b32.cont [6/16] (narrow) %v471_v45, 72 }
 0x15f   : > { %563 = vxpose.xlu1.b32.cont [6/16] (narrow) %v473_v47, 72 }
 0x161   : > { %v477_v49 = vpop.f32.mrb[12].mxu0  ;;  %v517_v50 = vpop.f32.mrb[12].mxu1 }
 0x162   : > { %532 = vxpose.xlu0.b32.cont [7/16] (narrow) %v477_v49, 72  ;;  %v479_v51 = vpop.f32.mrb[13].mxu0  ;;  %v519_v52 = vpop.f32.mrb[13].mxu1 }
 0x163   : > { %564 = vxpose.xlu1.b32.cont [7/16] (narrow) %v479_v51, 72  ;;  %v481_v53 = vpop.f32.mrb[14].mxu0  ;;  %v521_v54 = vpop.f32.mrb[14].mxu1 }
 0x164   : > { %v483_v55 = vpop.f32.mrb[15].mxu0  ;;  %v523_v56 = vpop.f32.mrb[15].mxu1 }
 0x166   : > { %533 = vxpose.xlu0.b32.cont [8/16] (narrow) %v481_v53, 72 }
 0x167   : > { %565 = vxpose.xlu1.b32.cont [8/16] (narrow) %v483_v55, 72 }
 0x16a   : > { %534 = vxpose.xlu0.b32.cont [9/16] (narrow) %v487_v26, 72 }
 0x16b   : > { %566 = vxpose.xlu1.b32.cont [9/16] (narrow) %v489_v28, 72 }
 0x16e   : > { %535 = vxpose.xlu0.b32.cont [10/16] (narrow) %v491_v30, 72 }
 0x16f   : > { %567 = vxpose.xlu1.b32.cont [10/16] (narrow) %v493_v32, 72 }
 0x172   : > { %536 = vxpose.xlu0.b32.cont [11/16] (narrow) %v497_v34, 72 }
 0x173   : > { %568 = vxpose.xlu1.b32.cont [11/16] (narrow) %v499_v36, 72 }
 0x176   : > { %537 = vxpose.xlu0.b32.cont [12/16] (narrow) %v501_v38, 72 }
 0x177   : > { %569 = vxpose.xlu1.b32.cont [12/16] (narrow) %v503_v40, 72 }
 0x17a   : > { %538 = vxpose.xlu0.b32.cont [13/16] (narrow) %v507_v42, 72 }
 0x17b   : > { %570 = vxpose.xlu1.b32.cont [13/16] (narrow) %v509_v44, 72 }
 0x17e   : > { %539 = vxpose.xlu0.b32.cont [14/16] (narrow) %v511_v46, 72 }
 0x17f   : > { %571 = vxpose.xlu1.b32.cont [14/16] (narrow) %v513_v48, 72 }
 0x182   : > { %540 = vxpose.xlu0.b32.cont [15/16] (narrow) %v517_v50, 72 }
 0x183   : > { %572 = vxpose.xlu1.b32.cont [15/16] (narrow) %v519_v52, 72 }
 0x186   : > { %541 = vxpose.xlu0.b32.end [16/16] (narrow) %v521_v54, 72 }
 0x187   : > { %573 = vxpose.xlu1.b32.end [16/16] (narrow) %v523_v56, 72 }
 0x1ca   : > { %v542_v57 = vpop.trf.xlu0 }
 0x1cb   : > { %590 = vst [vmem:[%s1216_s23] sm:$0xff] %v542_v57  ;;  %v574_v58 = vpop.trf.xlu1 }
 0x1cc   : > { %599 = vst [vmem:[%s1221_s5] sm:$0xff] %v574_v58 }
 0x1ce   : > { %v543_v59 = vpop.trf.xlu0 }
 0x1cf   : > { %591 = vst [vmem:[%s1216_s23 + $0x8] sm:$0xff] %v543_v59  ;;  %v575_v60 = vpop.trf.xlu1 }
 0x1d0   : > { %600 = vst [vmem:[%s1221_s5 + $0x8] sm:$0xff] %v575_v60 }
 0x1d2   : > { %v544_v61 = vpop.trf.xlu0 }
 0x1d3   : > { %592 = vst [vmem:[%s1216_s23 + $0x10] sm:$0xff] %v544_v61  ;;  %v576_v62 = vpop.trf.xlu1 }
 0x1d4   : > { %601 = vst [vmem:[%s1221_s5 + $0x10] sm:$0xff] %v576_v62 }
 0x1d6   : > { %v545_v63 = vpop.trf.xlu0 }
 0x1d7   : > { %593 = vst [vmem:[%s1216_s23 + $0x18] sm:$0xff] %v545_v63  ;;  %v577_v0 = vpop.trf.xlu1 }
 0x1d8   : > { %602 = vst [vmem:[%s1221_s5 + $0x18] sm:$0xff] %v577_v0 }
 0x1da   : > { %v546_v1 = vpop.trf.xlu0 }
 0x1db   : > { %594 = vst [vmem:[%s1216_s23 + $0x20] sm:$0xff] %v546_v1  ;;  %v578_v2 = vpop.trf.xlu1 }
 0x1dc   : > { %603 = vst [vmem:[%s1221_s5 + $0x20] sm:$0xff] %v578_v2 }
 0x1de   : > { %v547_v3 = vpop.trf.xlu0 }
 0x1df   : > { %595 = vst [vmem:[%s1216_s23 + $0x28] sm:$0xff] %v547_v3  ;;  %v579_v4 = vpop.trf.xlu1 }
 0x1e0   : > { %604 = vst [vmem:[%s1221_s5 + $0x28] sm:$0xff] %v579_v4 }
 0x1e2   : > { %v548_v5 = vpop.trf.xlu0 }
 0x1e3   : > { %596 = vst [vmem:[%s1216_s23 + $0x30] sm:$0xff] %v548_v5  ;;  %v580_v6 = vpop.trf.xlu1 }
 0x1e4   : > { %605 = vst [vmem:[%s1221_s5 + $0x30] sm:$0xff] %v580_v6 }
 0x1e6   : > { %v549_v7 = vpop.trf.xlu0 }
 0x1e7   : > { %597 = vst [vmem:[%s1216_s23 + $0x38] sm:$0xff] %v549_v7  ;;  %v581_v8 = vpop.trf.xlu1 }
 0x1e8   : > { %606 = vst [vmem:[%s1221_s5 + $0x38] sm:$0xff] %v581_v8 }
 0x1ea   : > { %v550_v9 = vpop.trf.xlu0 }
 0x1eb   : > { %598 = vst [vmem:[%s1216_s23 + $0x40] sm:$0x1] %v550_v9  ;;  %v582_v10 = vpop.trf.xlu1 }
 0x1ec   : > { %607 = vst [vmem:[%s1221_s5 + $0x40] sm:$0x1] %v582_v10 }
 0x1ed PF: > { %s18_s17 = sadd.s32 1, %s1029_s17   ;;  %s1275_s12 = smov %s1013_s13 }
 0x1ee   : > { %p15_p1 = scmp.ge.s32.totalorder %s18_s17, 4   ;;  %s1276_s13 = smov %s1017_s14 }
 0x1ef   : > { %s1277_s14 = smov %s1141_s27  ;;  %s1278_s15 = smov %s1025_s16 }
 0x1f0   : > { %s1279_s16 = smov %s1281_s25  ;;  %17 = sbr.rel (!%p15_p1) target bundleno = 5 (0x5), region = 84 }
 0x1f7   :  { %657 = vsyncpa [#allocation3], 1 }
 0x1f8   :  { %659 = vsyncpa [#allocation3 + $0x1], 1 }
 0x1f9   :  { %660 = vsyncpa [#allocation5], 1 }

</bundles_post_ra>
